<compile_context>
chip_gen: v7x
topology: tpu7x:2x2x1
jax: 0.10.0
libtpu: 0.0.40
codegen_flags: <defaults>
</compile_context>

<pallas_src>
import jax
import jax.numpy as jnp
from jax.experimental import pallas as pl
from jax.experimental.pallas import tpu as pltpu


def _round_up(n, m):
    return (n + m - 1) // m * m


def se_block_kernel(x_ref, w1_ref, b1_ref, w2_ref, b2_ref, o_ref):
    # x_ref: (tile_b, D_pad). Weights/biases are grid-invariant (resident).
    x = x_ref[...]
    h = jnp.dot(x, w1_ref[...], preferred_element_type=jnp.float32)     # (tile_b, H_pad)
    h = jnp.tanh(h + b1_ref[...])                                        # f32 activations (v5e-safe)
    # Dropout(p) in eval mode == identity.
    z = jnp.dot(h.astype(w2_ref.dtype), w2_ref[...],
                preferred_element_type=jnp.float32) + b2_ref[...]        # (tile_b, D_pad)
    # sigmoid spelled as exp + reciprocal: both transcendentals ride the EUP
    # slot, leaving VALU slots free (kernel is mem-bound anyway).
    y = 1.0 / (1.0 + jnp.exp(-z))
    o_ref[...] = y.astype(o_ref.dtype)


def se_block(x, w1, b1, w2, b2, *, tile_b=256, use_bf16=False):
    """Fused SE block: sigmoid(tanh(x @ w1 + b1) @ w2 + b2).

    x: (B, D); w1: (D, H); b1: (H,)/(1, H); w2: (H, D); b2: (D,)/(1, D).
    Weights are stored pre-transposed (x @ W layout).
    """
    B, D = x.shape
    H = w1.shape[1]
    out_dtype = x.dtype

    # ---- layout hygiene: pad to lane/sublane-friendly shapes -------------
    D_pad = _round_up(D, 128)                       # lane-dense x / output
    H_pad = _round_up(H, 128)                       # hidden 20 -> 128
    tile_b = max(8, min(_round_up(tile_b, 8), _round_up(B, 8)))
    B_pad = _round_up(B, tile_b)

    b1 = b1.reshape(1, -1)
    b2 = b2.reshape(1, -1)

    # Zero padding is semantically free: padded x cols hit zero w1 rows,
    # padded hidden cols hit zero w2 rows, padded output cols are sliced off.
    xp = jnp.pad(x, ((0, B_pad - B), (0, D_pad - D)))
    w1p = jnp.pad(w1, ((0, D_pad - D), (0, H_pad - H)))
    b1p = jnp.pad(b1, ((0, 0), (0, H_pad - H)))
    w2p = jnp.pad(w2, ((0, H_pad - H), (0, D_pad - D)))
    b2p = jnp.pad(b2, ((0, 0), (0, D_pad - D)))

    if use_bf16:
        # Halves HBM traffic / VMEM tile footprint (v6e/v7x win); biases and
        # activations stay f32, dots accumulate in f32.
        xp = xp.astype(jnp.bfloat16)
        w1p = w1p.astype(jnp.bfloat16)
        w2p = w2p.astype(jnp.bfloat16)

    grid = (B_pad // tile_b,)
    x_spec = pl.BlockSpec((tile_b, D_pad), lambda i: (i, 0))
    o_spec = pl.BlockSpec((tile_b, D_pad), lambda i: (i, 0))
    # Constant index_maps -> weights fetched once, resident across the grid.
    w1_spec = pl.BlockSpec((D_pad, H_pad), lambda i: (0, 0))
    b1_spec = pl.BlockSpec((1, H_pad), lambda i: (0, 0))
    w2_spec = pl.BlockSpec((H_pad, D_pad), lambda i: (0, 0))
    b2_spec = pl.BlockSpec((1, D_pad), lambda i: (0, 0))

    out = pl.pallas_call(
        se_block_kernel,
        out_shape=jax.ShapeDtypeStruct((B_pad, D_pad), out_dtype),
        grid=grid,
        in_specs=[x_spec, w1_spec, b1_spec, w2_spec, b2_spec],
        out_specs=o_spec,
        compiler_params=pltpu.CompilerParams(
            dimension_semantics=("parallel",),   # megacore on v7x
            vmem_limit_bytes=48 << 20,           # above 16/32 MiB scoped defaults,
        ),                                       # below v7x's 64 MiB physical
    )(xp, w1p, b1p, w2p, b2p)

    return out[:B, :D]


def init_params(key, data_dim, hidden=20, dtype=jnp.float32):
    """Deterministic init mimicking nn.Linear's uniform(-1/sqrt(fan_in), ...)."""
    k1, k2, k3, k4 = jax.random.split(key, 4)
    bound1 = 1.0 / jnp.sqrt(data_dim)
    bound2 = 1.0 / jnp.sqrt(hidden)
    # Stored transposed so the kernel computes x @ W directly.
    w1 = jax.random.uniform(k1, (data_dim, hidden), dtype, -bound1, bound1)
    b1 = jax.random.uniform(k2, (1, hidden), dtype, -bound1, bound1)
    w2 = jax.random.uniform(k3, (hidden, data_dim), dtype, -bound2, bound2)
    b2 = jax.random.uniform(k4, (1, data_dim), dtype, -bound2, bound2)
    return w1, b1, w2, b2


def se_block_ref(x, w1, b1, w2, b2):
    h = jnp.tanh(x @ w1 + b1)
    return jax.nn.sigmoid(h @ w2 + b2)


if __name__ == "__main__":
    key = jax.random.PRNGKey(0)
    kx, kp = jax.random.split(key)

    batch, data_dim = 8, 32
    x = jax.random.normal(kx, (batch, data_dim), jnp.float32)
    w1, b1, w2, b2 = init_params(kp, data_dim)

    ref = se_block_ref(x, w1, b1, w2, b2)

    # f32 path (default): must match reference tightly.
    out = jax.block_until_ready(se_block(x, w1, b1, w2, b2))
    assert out.shape == (batch, data_dim)
    assert jnp.allclose(out, ref, atol=1e-5, rtol=1e-5)

    # bf16-I/O path (v6e/v7x HBM-roofline option): loose tolerance.
    out_bf16 = jax.block_until_ready(se_block(x, w1, b1, w2, b2, use_bf16=True))
    assert out_bf16.shape == (batch, data_dim)
    assert jnp.allclose(out_bf16, ref, atol=3e-2, rtol=3e-2)

    print("KERNEL_OK")
</pallas_src>

<mosaic_0001>
module attributes {stable_mosaic.version = 11 : i64} {
  func.func @se_block_kernel(%arg0: i32, %arg1: memref<8x128xf32, #tpu.memory_space<vmem>>, %arg2: memref<128x128xf32, #tpu.memory_space<vmem>>, %arg3: memref<1x128xf32, #tpu.memory_space<vmem>>, %arg4: memref<128x128xf32, #tpu.memory_space<vmem>>, %arg5: memref<1x128xf32, #tpu.memory_space<vmem>>, %arg6: memref<8x128xf32, #tpu.memory_space<vmem>>) attributes {dimension_semantics = [#tpu.dimension_semantics<parallel>], iteration_bounds = array<i64: 1>, scalar_prefetch = 0 : i64, scratch_operands = 0 : i64, tpu.core_type = #tpu.core_type<tc>, window_params = [{transform_indices = @transform_0, window_bounds = array<i64: 8, 128>}, {pipeline_mode = #tpu.pipeline_mode<synchronous>, transform_indices = @transform_1, window_bounds = array<i64: 128, 128>}, {pipeline_mode = #tpu.pipeline_mode<synchronous>, transform_indices = @transform_2, window_bounds = array<i64: 1, 128>}, {pipeline_mode = #tpu.pipeline_mode<synchronous>, transform_indices = @transform_3, window_bounds = array<i64: 128, 128>}, {pipeline_mode = #tpu.pipeline_mode<synchronous>, transform_indices = @transform_4, window_bounds = array<i64: 1, 128>}, {transform_indices = @transform_5, window_bounds = array<i64: 8, 128>}]} {
    %c0 = arith.constant 0 : index
    %c0_0 = arith.constant 0 : index
    %0 = vector.load %arg1[%c0, %c0_0] : memref<8x128xf32, #tpu.memory_space<vmem>>, vector<8x128xf32>
    %c0_1 = arith.constant 0 : index
    %c0_2 = arith.constant 0 : index
    %1 = vector.load %arg2[%c0_1, %c0_2] : memref<128x128xf32, #tpu.memory_space<vmem>>, vector<128x128xf32>
    %cst = arith.constant dense<0.000000e+00> : vector<8x128xf32>
    %2 = tpu.matmul %0, %1, %cst {dimension_numbers = #tpu.dot_dimension_numbers<[1], [0], [0], [1], [0, 0, 1, 1], [], []>} : vector<8x128xf32>, vector<128x128xf32>, vector<8x128xf32> -> vector<8x128xf32>
    %c0_3 = arith.constant 0 : index
    %c0_4 = arith.constant 0 : index
    %3 = vector.load %arg3[%c0_3, %c0_4] : memref<1x128xf32, #tpu.memory_space<vmem>>, vector<1x128xf32>
    %4 = vector.broadcast %3 : vector<1x128xf32> to vector<8x128xf32>
    %5 = arith.addf %2, %4 : vector<8x128xf32>
    %6 = math.tanh %5 : vector<8x128xf32>
    %c0_5 = arith.constant 0 : index
    %c0_6 = arith.constant 0 : index
    %7 = vector.load %arg4[%c0_5, %c0_6] : memref<128x128xf32, #tpu.memory_space<vmem>>, vector<128x128xf32>
    %cst_7 = arith.constant dense<0.000000e+00> : vector<8x128xf32>
    %8 = tpu.matmul %6, %7, %cst_7 {dimension_numbers = #tpu.dot_dimension_numbers<[1], [0], [0], [1], [0, 0, 1, 1], [], []>} : vector<8x128xf32>, vector<128x128xf32>, vector<8x128xf32> -> vector<8x128xf32>
    %c0_8 = arith.constant 0 : index
    %c0_9 = arith.constant 0 : index
    %9 = vector.load %arg5[%c0_8, %c0_9] : memref<1x128xf32, #tpu.memory_space<vmem>>, vector<1x128xf32>
    %10 = vector.broadcast %9 : vector<1x128xf32> to vector<8x128xf32>
    %11 = arith.addf %8, %10 : vector<8x128xf32>
    %cst_10 = arith.constant 0.000000e+00 : f32
    %12 = vector.broadcast %cst_10 : f32 to vector<8x128xf32>
    %13 = arith.subf %12, %11 : vector<8x128xf32>
    %14 = math.exp %13 : vector<8x128xf32>
    %cst_11 = arith.constant 1.000000e+00 : f32
    %15 = vector.broadcast %cst_11 : f32 to vector<8x128xf32>
    %16 = arith.addf %15, %14 : vector<8x128xf32>
    %cst_12 = arith.constant 1.000000e+00 : f32
    %17 = vector.broadcast %cst_12 : f32 to vector<8x128xf32>
    %18 = arith.divf %17, %16 : vector<8x128xf32>
    %c0_13 = arith.constant 0 : index
    %c0_14 = arith.constant 0 : index
    %19 = vector.load %arg6[%c0_13, %c0_14] : memref<8x128xf32, #tpu.memory_space<vmem>>, vector<8x128xf32>
    tpu.vector_store %arg6[%c0_13, %c0_14], %18 {strides = array<i32>} : memref<8x128xf32, #tpu.memory_space<vmem>>, vector<8x128xf32>,
    return
  }
  func.func @transform_0(%arg0: i32) -> (i32, i32) {
    %c0_i32 = arith.constant 0 : i32
    %c0_i32_0 = arith.constant 0 : i32
    return %arg0, %c0_i32 : i32, i32
  }
  func.func @transform_1(%arg0: i32) -> (i32, i32) {
    %c0_i32 = arith.constant 0 : i32
    %c0_i32_0 = arith.constant 0 : i32
    %c0_i32_1 = arith.constant 0 : i32
    return %c0_i32, %c0_i32_0 : i32, i32
  }
  func.func @transform_2(%arg0: i32) -> (i32, i32) {
    %c0_i32 = arith.constant 0 : i32
    %c0_i32_0 = arith.constant 0 : i32
    %c0_i32_1 = arith.constant 0 : i32
    return %c0_i32, %c0_i32_0 : i32, i32
  }
  func.func @transform_3(%arg0: i32) -> (i32, i32) {
    %c0_i32 = arith.constant 0 : i32
    %c0_i32_0 = arith.constant 0 : i32
    %c0_i32_1 = arith.constant 0 : i32
    return %c0_i32, %c0_i32_0 : i32, i32
  }
  func.func @transform_4(%arg0: i32) -> (i32, i32) {
    %c0_i32 = arith.constant 0 : i32
    %c0_i32_0 = arith.constant 0 : i32
    %c0_i32_1 = arith.constant 0 : i32
    return %c0_i32, %c0_i32_0 : i32, i32
  }
  func.func @transform_5(%arg0: i32) -> (i32, i32) {
    %c0_i32 = arith.constant 0 : i32
    %c0_i32_0 = arith.constant 0 : i32
    return %arg0, %c0_i32 : i32, i32
  }
}

</mosaic_0001>

<bundles_post_ra>
// kernel: tpu_custom_call.1
= control target key start
LH: loop header
LB: loop body
LE: loop exit
PB: predicated region body
PF: predicated region fallthrough
CT: control target
= control target key end

     0   :  { %10 = vsyncpa [#allocation3], 0  ;;  %s649_s0 = inlined_call_operand.hbm [shape: f32[8,128], index: 0, kind: input, shape index: {}]   ;;  %s650_s1 = inlined_call_operand.hbm [shape: f32[128,128], index: 1, kind: input, shape index: {}]   ;;  %s651_s2 = inlined_call_operand.vmem [shape: f32[1,128], index: 2, kind: input, shape index: {}]   ;;  %s652_s3 = inlined_call_operand.hbm [shape: f32[128,128], index: 3, kind: input, shape index: {}]   ;;  %s653_s4 = inlined_call_operand.vmem [shape: f32[1,128], index: 4, kind: input, shape index: {}]   ;;  %s654_s5 = inlined_call_operand.hbm [shape: f32[8,128], index: 5, kind: output, shape index: {}]  }
   0x1   :  { %11 = vsyncpa [#allocation6], 0 }
   0x2   :  { %12 = vsyncpa [#allocation4], 0  ;;  %s534_s18 = smov [#allocation5]   ;;  %s440_s22 = scalar_lea.hbm %s650_s1, 2048 }
   0x3   :  { %s28_s19 = sshll.u32 %s534_s18, 4  ;;  %p441_p0 = scmp.ne.s32.totalorder %s650_s1, %s440_s22  ;;  %s29_s19 = int_to_ptr.vmem [resolvable:$true] %s28_s19 }
   0x4   :  { %p444_p1 = scmp.lt.u32.totalorder %s440_s22, %s650_s1 }
   0x6   :  { %p446_p2 = pnand %p444_p1, %p441_p0 }
   0x8   :  { %449 = shalt.err (!%p446_p2)
}
   0x9   :  { %s450_s27 = scalar_lea.vmem %s29_s19, 2048  ;;  %p455_p4 = scmp.lt.s32.totalorder %s29_s19, %s29_s19 }
   0xa   :  { %p451_p3 = scmp.ne.s32.totalorder %s29_s19, %s450_s27  ;;  %p456_p5 = scmp.lt.s32.totalorder %s450_s27, %s450_s27 }
   0xc   :  { %p457_p6 = por %p456_p5, %p455_p4 }
   0xe   :  { %p458_p7 = pnand %p457_p6, %p451_p3 }
  0x10   :  { %461 = shalt.err (!%p458_p7)
}
  0x11   :  { %s535_s28 = smov 128   ;;  %s536_s29 = smov 8  }
  0x12   :  { %34 = dma.hbm_to_vmem [thread:$0]  %s650_s1, 2048, %s29_s19, [#allocation6], %s535_s28, %s535_s28, %s536_s29  }
  0x13   :  { %s537_s7 = smov [#allocation2]   ;;  %s538_s9 = smov [#allocation7]  }
  0x14   :  { %s19_s8 = sshll.u32 %s537_s7, 4  ;;  %s42_s10 = sshll.u32 %s538_s9, 4  ;;  %s20_s8 = int_to_ptr.vmem [resolvable:$true] %s19_s8  ;;  %s43_s10 = int_to_ptr.vmem [resolvable:$true] %s42_s10 }
  0x15   :  { %s462_s13 = scalar_lea.hbm %s649_s0, 128 }
  0x16   :  { %p463_p8 = scmp.ne.s32.totalorder %s649_s0, %s462_s13  ;;  %p466_p9 = scmp.lt.u32.totalorder %s462_s13, %s649_s0 }
  0x18   :  { %p468_p10 = pnand %p466_p9, %p463_p8 }
  0x1a   :  { %471 = shalt.err (!%p468_p10)
}
  0x1b   :  { %s472_s1 = scalar_lea.vmem %s20_s8, 128  ;;  %p477_p12 = scmp.lt.s32.totalorder %s20_s8, %s20_s8 }
  0x1c   :  { %p473_p11 = scmp.ne.s32.totalorder %s20_s8, %s472_s1  ;;  %p478_p13 = scmp.lt.s32.totalorder %s472_s1, %s472_s1 }
  0x1e   :  { %p479_p0 = por %p478_p13, %p477_p12 }
  0x20   :  { %p480_p1 = pnand %p479_p0, %p473_p11 }
  0x22   :  { %483 = shalt.err (!%p480_p1)
}
  0x23   :  { %22 = dma.hbm_to_vmem [thread:$0]  %s649_s0, 128, %s20_s8, [#allocation3]  }
  0x24   :  { %s484_s22 = scalar_lea.hbm %s652_s3, 2048 }
  0x25   :  { %p485_p2 = scmp.ne.s32.totalorder %s652_s3, %s484_s22  ;;  %p488_p3 = scmp.lt.u32.totalorder %s484_s22, %s652_s3 }
  0x27   :  { %p490_p4 = pnand %p488_p3, %p485_p2 }
  0x29   :  { %493 = shalt.err (!%p490_p4)
}
  0x2a   :  { %s494_s27 = scalar_lea.vmem %s43_s10, 2048  ;;  %p499_p6 = scmp.lt.s32.totalorder %s43_s10, %s43_s10 }
  0x2b   :  { %p495_p5 = scmp.ne.s32.totalorder %s43_s10, %s494_s27  ;;  %p500_p7 = scmp.lt.s32.totalorder %s494_s27, %s494_s27 }
  0x2d   :  { %p501_p8 = por %p500_p7, %p499_p6 }
  0x2f   :  { %p502_p9 = pnand %p501_p8, %p495_p5 }
  0x31   :  { %505 = shalt.err (!%p502_p9)
}
  0x32   :  { %48 = dma.hbm_to_vmem [thread:$0]  %s652_s3, 2048, %s43_s10, [#allocation6], %s535_s28, %s535_s28, %s536_s29  }
  0x33   :  { %528 = dma.done.wait [#allocation3], 128  }
  0x34   :  { %529 = vsyncadd [#allocation3], 4294967168 }
  0x35   :  { %530 = dma.done.wait [#allocation6], 4096  }
  0x36   :  { %531 = vsyncadd [#allocation6], 4294963200  ;;  %v539_v0 = vmov 0.0|0.0   ;;  %vm540_vm0 = vmmov 0   ;;  %v541_v1 = vmov 0.0   ;;  %v61_v2 = vld [vmem:[#allocation5] sm:$0xff] }
  0x37   :  { %377 = vmatprep.subr.bf16.mxu0 %v539_v0  ;;  %339 = vmatprep.mubr.msk.f32.mxu0 %vm540_vm0, %v541_v1  ;;  %v62_v3 = vld [vmem:[#allocation5 + $0x8] sm:$0xff]  ;;  %v63_v4 = vld [vmem:[#allocation5 + $0x10] sm:$0xff]  ;;  %v64_v6 = vld [vmem:[#allocation5 + $0x18] sm:$0xff] }
  0x38   :  { %401 = vmatprep.subr.bf16.mxu1 %v539_v0  ;;  %374 = vmatprep.mubr.msk.f32.mxu1 %vm540_vm0, %v541_v1  ;;  %v378_v5 = vpack.c.bf16 %v62_v3, %v61_v2  ;;  %v381_v7 = vpack.c.bf16 %v64_v6, %v63_v4  ;;  %v65_v8 = vld [vmem:[#allocation5 + $0x20] sm:$0xff]  ;;  %v66_v9 = vld [vmem:[#allocation5 + $0x28] sm:$0xff]  ;;  %v157_v12 = vld [vmem:[#allocation7 + $0x10] sm:$0xff] }
  0x39   :  { %v155_v10 = vld [vmem:[#allocation7] sm:$0xff]  ;;  %v156_v11 = vld [vmem:[#allocation7 + $0x8] sm:$0xff]  ;;  %v158_v13 = vld [vmem:[#allocation7 + $0x18] sm:$0xff]  ;;  %v384_v14 = vpack.c.bf16 %v66_v9, %v65_v8 }
  0x3a   :  { %379 = vmatpush3.bf16.msra.mxu0 %v378_v5  ;;  %v402_v15 = vpack.c.bf16 %v156_v11, %v155_v10  ;;  %v67_v16 = vld [vmem:[#allocation5 + $0x30] sm:$0xff]  ;;  %v68_v17 = vld [vmem:[#allocation5 + $0x38] sm:$0xff]  ;;  %v405_v18 = vpack.c.bf16 %v158_v13, %v157_v12  ;;  %v159_v19 = vld [vmem:[#allocation7 + $0x20] sm:$0xff] }
  0x3b   :  { %380 = vmatprep.subr.bf16.mxu0 %v539_v0  ;;  %v160_v20 = vld [vmem:[#allocation7 + $0x28] sm:$0xff]  ;;  %v387_v21 = vpack.c.bf16 %v68_v17, %v67_v16  ;;  %v69_v22 = vld [vmem:[#allocation5 + $0x40] sm:$0xff]  ;;  %v161_v25 = vld [vmem:[#allocation7 + $0x30] sm:$0xff] }
  0x3c   :  { %403 = vmatpush3.bf16.msra.mxu1 %v402_v15  ;;  %v70_v23 = vld [vmem:[#allocation5 + $0x48] sm:$0xff]  ;;  %v408_v24 = vpack.c.bf16 %v160_v20, %v159_v19  ;;  %v162_v26 = vld [vmem:[#allocation7 + $0x38] sm:$0xff]  ;;  %v71_v28 = vld [vmem:[#allocation5 + $0x50] sm:$0xff] }
  0x3d   :  { %404 = vmatprep.subr.bf16.mxu1 %v539_v0  ;;  %v390_v27 = vpack.c.bf16 %v70_v23, %v69_v22  ;;  %v72_v29 = vld [vmem:[#allocation5 + $0x58] sm:$0xff]  ;;  %v411_v30 = vpack.c.bf16 %v162_v26, %v161_v25  ;;  %v163_v31 = vld [vmem:[#allocation7 + $0x40] sm:$0xff]  ;;  %v164_v32 = vld [vmem:[#allocation7 + $0x48] sm:$0xff] }
  0x3e   :  { %382 = vmatpush3.bf16.msra.mxu0 %v381_v7  ;;  %v393_v33 = vpack.c.bf16 %v72_v29, %v71_v28  ;;  %v73_v34 = vld [vmem:[#allocation5 + $0x60] sm:$0xff]  ;;  %v74_v35 = vld [vmem:[#allocation5 + $0x68] sm:$0xff]  ;;  %v414_v36 = vpack.c.bf16 %v164_v32, %v163_v31  ;;  %v75_v38 = vld [vmem:[#allocation5 + $0x70] sm:$0xff] }
  0x3f   :  { %383 = vmatprep.subr.bf16.mxu0 %v539_v0  ;;  %v396_v37 = vpack.c.bf16 %v74_v35, %v73_v34  ;;  %v76_v39 = vld [vmem:[#allocation5 + $0x78] sm:$0xff]  ;;  %v165_v42 = vld [vmem:[#allocation7 + $0x50] sm:$0xff]  ;;  %v167_v45 = vld [vmem:[#allocation7 + $0x60] sm:$0xff] }
  0x40   :  { %406 = vmatpush3.bf16.msra.mxu1 %v405_v18  ;;  %v399_v40 = vpack.c.bf16 %v76_v39, %v75_v38  ;;  %v60_v41 = vld [vmem:[#allocation2] sm:$0xff]  ;;  %v168_v46 = vld [vmem:[#allocation7 + $0x68] sm:$0xff]  ;;  %v169_v48 = vld [vmem:[#allocation7 + $0x70] sm:$0xff] }
  0x41   :  { %407 = vmatprep.subr.bf16.mxu1 %v539_v0  ;;  %v166_v43 = vld [vmem:[#allocation7 + $0x58] sm:$0xff]  ;;  %v420_v47 = vpack.c.bf16 %v168_v46, %v167_v45 }
  0x42   :  { %385 = vmatpush3.bf16.msra.mxu0 %v384_v14  ;;  %v417_v44 = vpack.c.bf16 %v166_v43, %v165_v42  ;;  %v170_v49 = vld [vmem:[#allocation7 + $0x78] sm:$0xff] }
  0x43   :  { %386 = vmatprep.subr.bf16.mxu0 %v539_v0  ;;  %v423_v50 = vpack.c.bf16 %v170_v49, %v169_v48  ;;  %v271_v51 = vld [vmem:[%s651_s2] ss:$0 sm:$0xff]  ;;  %s542_s2 = smov [#allocation8]  }
  0x44   :  { %409 = vmatpush3.bf16.msra.mxu1 %v408_v24  ;;  %v272_v56 = vld [vmem:[%s653_s4] ss:$0 sm:$0xff]  ;;  %s261_s7 = sshll.u32 %s542_s2, 4  ;;  %s262_s7 = int_to_ptr.vmem [resolvable:$true] %s261_s7 }
  0x45   :  { %410 = vmatprep.subr.bf16.mxu1 %v539_v0  ;;  %s506_s8 = scalar_lea.vmem %s262_s7, 128  ;;  %p511_p11 = scmp.lt.s32.totalorder %s262_s7, %s262_s7 }
  0x46   :  { %388 = vmatpush3.bf16.msra.mxu0 %v387_v21  ;;  %p507_p10 = scmp.ne.s32.totalorder %s262_s7, %s506_s8  ;;  %p512_p12 = scmp.lt.s32.totalorder %s506_s8, %s506_s8 }
  0x47   :  { %389 = vmatprep.subr.bf16.mxu0 %v539_v0 }
  0x48   :  { %412 = vmatpush3.bf16.msra.mxu1 %v411_v30  ;;  %p513_p13 = por %p512_p12, %p511_p11 }
  0x49   :  { %413 = vmatprep.subr.bf16.mxu1 %v539_v0 }
  0x4a   :  { %391 = vmatpush3.bf16.msra.mxu0 %v390_v27  ;;  %p514_p0 = pnand %p513_p13, %p507_p10 }
  0x4b   :  { %392 = vmatprep.subr.bf16.mxu0 %v539_v0 }
  0x4c   :  { %415 = vmatpush3.bf16.msra.mxu1 %v414_v36 }
  0x4d   :  { %416 = vmatprep.subr.bf16.mxu1 %v539_v0 }
  0x4e   :  { %394 = vmatpush3.bf16.msra.mxu0 %v393_v33 }
  0x4f   :  { %395 = vmatprep.subr.bf16.mxu0 %v539_v0 }
  0x50   :  { %418 = vmatpush3.bf16.msra.mxu1 %v417_v44 }
  0x51   :  { %419 = vmatprep.subr.bf16.mxu1 %v539_v0 }
  0x52   :  { %397 = vmatpush3.bf16.msra.mxu0 %v396_v37 }
  0x53   :  { %398 = vmatprep.subr.bf16.mxu0 %v539_v0 }
  0x54   :  { %421 = vmatpush3.bf16.msra.mxu1 %v420_v47 }
  0x55   :  { %422 = vmatprep.subr.bf16.mxu1 %v539_v0 }
  0x56   :  { %400 = vmatpush3.bf16.msra.mxu0 %v399_v40 }
  0x58   :  { %424 = vmatpush3.bf16.msra.mxu1 %v423_v50 }
  0x59   :  { %340 = vmatmul.mubr.f32.vlgmr.msra.gmra.mrb[0].mxu0 %v60_v41 }
 0x12c   :  { %v150_v52 = vpop.f32.mrb[0].mxu0 }
 0x12d   :  { %v151_v53 = vadd.f32 %v271_v51, %v150_v52  ;;  %v341_v54 = vpop.f32.mrb[1].mxu0 }
 0x12f   :  { %434 = vtanh.f32 %v151_v53 }
 0x139   :  { %v435_v55 = vpop.eup %434 }
 0x13a   :  { %375 = vmatmul.mubr.f32.vlgmr.msra.gmra.mrb[0].mxu1 %v435_v55 }
 0x20d   :  { %v244_v57 = vpop.f32.mrb[0].mxu1 }
 0x20e   :  { %v245_v58 = vadd.f32 %v272_v56, %v244_v57  ;;  %v376_v59 = vpop.f32.mrb[1].mxu1 }
 0x210   :  { %v248_v60 = vsub.f32 0.0, %v245_v58 }
 0x212   :  { %v249_v61 = vmul.f32 1.442695, %v248_v60 }
 0x214   :  { %436 = vpow2.f32 %v249_v61 }
 0x21e   :  { %v437_v62 = vpop.eup %436 }
 0x21f   :  { %v251_v63 = vadd.f32 1.0, %v437_v62 }
 0x221   :  { %438 = vrcp.f32 %v251_v63 }
 0x22b   :  { %v439_v0 = vpop.eup %438 }
 0x22c   :  { %254 = vst [vmem:[#allocation8] sm:$0xff] %v439_v0 }
 0x22d   :  { %517 = shalt.err (!%p514_p0)
}
 0x22e   :  { %s518_s10 = scalar_lea.hbm %s654_s5, 128 }
 0x22f   :  { %p519_p1 = scmp.ne.s32.totalorder %s654_s5, %s518_s10  ;;  %p522_p2 = scmp.lt.u32.totalorder %s518_s10, %s654_s5 }
 0x231   :  { %p524_p3 = pnand %p522_p2, %p519_p1 }
 0x233   :  { %527 = shalt.err (!%p524_p3)
}
 0x234   :  { %264 = dma.vmem_to_hbm [thread:$0]  %s262_s7, 128, %s654_s5, [#allocation4]  }
 0x235   :  { %532 = dma.done.wait [#allocation4], 128  }
 0x236   :  { %533 = vsyncadd [#allocation4], 4294967168 }
 0x237   :  { %268 = vsyncpa [#allocation3], 1 }
 0x238   :  { %269 = vsyncpa [#allocation6], 1 }
 0x239   :  { %270 = vsyncpa [#allocation4], 1 }

</bundles_post_ra>
